<compile_context>
chip_gen: v7x
topology: tpu7x:2x2x1
jax: 0.10.0
libtpu: 0.0.40
codegen_flags: <defaults>
</compile_context>

<pallas_src>
import jax
import jax.numpy as jnp
from jax.experimental import pallas as pl
from jax.experimental.pallas import tpu as pltpu


def next_img_pred_kernel(x_ref, wt_ref, b_ref, o_ref):
    # x_ref : (tile_b, H)  VMEM, native dtype (bf16/f32)
    # wt_ref: (H, 2)       VMEM, native dtype, resident across the grid
    # b_ref : (1, 2)       VMEM, f32, resident
    # o_ref : (tile_b, 2)  VMEM, f32 log-probs
    logits = jnp.dot(x_ref[...], wt_ref[...],
                     preferred_element_type=jnp.float32)   # MXU, f32 acc
    logits = logits + b_ref[...]
    # 2-class log-softmax, element-wise (no axis=-1 cross-lane reduction).
    l0 = logits[:, 0:1]
    l1 = logits[:, 1:2]
    m = jnp.maximum(l0, l1)
    lse = m + jnp.log(jnp.exp(l0 - m) + jnp.exp(l1 - m))
    o_ref[...] = (logits - lse).astype(o_ref.dtype)


def _round_up(x, m):
    return ((x + m - 1) // m) * m


def next_img_prediction(x, weight, bias, *, tile_b=None):
    """x: [B, H] (bf16 or f32); weight: [2, H]; bias: [2] -> [B, 2] f32 log-probs."""
    B, H = x.shape
    itemsize = jnp.dtype(x.dtype).itemsize
    row_align = 16 if itemsize == 2 else 8          # sublane packing for the x tile

    if tile_b is None:
        # ~8 MiB budget for the double-buffered x stream; cap at 1024 rows
        # (>=512 rows already reaches ~85% of HBM roofline).
        x_budget = 8 << 20
        t = x_budget // (2 * H * itemsize)
        t = max(row_align, min(t, 1024))
        b_ceil = _round_up(B, row_align)
        if b_ceil >= 2 * row_align:
            # Keep the grid >= 2 steps so the "parallel" axis can be sharded
            # across TensorCores (free ~2x on v7x).
            t = min(t, max(row_align, ((b_ceil // 2) // row_align) * row_align))
        tile_b = min(t, b_ceil)
    tile_b = max(row_align, (int(tile_b) // row_align) * row_align)

    B_pad = _round_up(B, tile_b)
    if B_pad != B:
        x = jnp.pad(x, ((0, B_pad - B), (0, 0)))

    wt = weight.T                                    # [H, 2], native dtype
    b2 = bias.reshape(1, 2).astype(jnp.float32)      # [1, 2], f32

    grid = (B_pad // tile_b,)

    # VMEM accounting: double-buffered x + out streams, resident W^T / bias.
    vmem_needed = (2 * tile_b * H * itemsize                       # x stream
                   + 2 * tile_b * 2 * 4                            # out stream
                   + 2 * (H * 2 * jnp.dtype(weight.dtype).itemsize + 2 * 4))
    vmem_limit = int(min(max(2 * vmem_needed, 4 << 20), 30 << 20))

    out = pl.pallas_call(
        next_img_pred_kernel,
        out_shape=jax.ShapeDtypeStruct((B_pad, 2), jnp.float32),
        grid_spec=pltpu.PrefetchScalarGridSpec(
            num_scalar_prefetch=0,
            grid=grid,
            in_specs=[
                pl.BlockSpec((tile_b, H), lambda i: (i, 0)),   # x tile (streamed)
                pl.BlockSpec((H, 2),      lambda i: (0, 0)),   # W^T (full, resident)
                pl.BlockSpec((1, 2),      lambda i: (0, 0)),   # bias (full, resident)
            ],
            out_specs=pl.BlockSpec((tile_b, 2), lambda i: (i, 0)),
        ),
        compiler_params=pltpu.CompilerParams(
            dimension_semantics=("parallel",),
            vmem_limit_bytes=vmem_limit),
    )(x, wt, b2)

    return out[:B] if B_pad != B else out


def reference(x, weight, bias):
    logits = x @ weight.T + bias
    return jax.nn.log_softmax(logits, axis=-1)


if __name__ == "__main__":
    key = jax.random.PRNGKey(0)
    kx, kw, kb = jax.random.split(key, 3)

    batch, hidden = 8, 32

    # --- bf16 path (native model dtype; no host upcast) ---
    x_bf = jax.random.normal(kx, (batch, hidden), dtype=jnp.float32).astype(jnp.bfloat16)
    w_bf = (jax.random.normal(kw, (2, hidden), dtype=jnp.float32)
            * (1.0 / hidden ** 0.5)).astype(jnp.bfloat16)
    b = jax.random.normal(kb, (2,), dtype=jnp.float32) * 0.1

    out_bf = jax.block_until_ready(next_img_prediction(x_bf, w_bf, b))
    ref_bf = reference(x_bf.astype(jnp.float32), w_bf.astype(jnp.float32), b)
    assert out_bf.shape == (batch, 2)
    assert out_bf.dtype == jnp.float32
    assert jnp.allclose(out_bf, ref_bf, atol=2e-3, rtol=2e-3), "bf16 path mismatch"

    # --- f32 path with a batch that exercises multi-step grid + padding ---
    batch2 = 20
    x_f32 = jax.random.normal(kx, (batch2, hidden), dtype=jnp.float32)
    w_f32 = jax.random.normal(kw, (2, hidden), dtype=jnp.float32) * (1.0 / hidden ** 0.5)
    out_f32 = jax.block_until_ready(
        next_img_prediction(x_f32, w_f32, b, tile_b=8))
    ref_f32 = reference(x_f32, w_f32, b)
    assert out_f32.shape == (batch2, 2)
    assert jnp.allclose(out_f32, ref_f32, atol=1e-2, rtol=1e-2), "f32 path mismatch"

    print("KERNEL_OK")
</pallas_src>

<mosaic_0001>
module attributes {stable_mosaic.version = 11 : i64} {
  func.func @next_img_pred_kernel(%arg0: i32, %arg1: memref<16x32xbf16, #tpu.memory_space<vmem>>, %arg2: memref<32x2xbf16, #tpu.memory_space<vmem>>, %arg3: memref<1x2xf32, #tpu.memory_space<vmem>>, %arg4: memref<16x2xf32, #tpu.memory_space<vmem>>) attributes {dimension_semantics = [#tpu.dimension_semantics<parallel>], iteration_bounds = array<i64: 1>, scalar_prefetch = 0 : i64, scratch_operands = 0 : i64, tpu.core_type = #tpu.core_type<tc>, window_params = [{transform_indices = @transform_0, window_bounds = array<i64: 16, 32>}, {pipeline_mode = #tpu.pipeline_mode<synchronous>, transform_indices = @transform_1, window_bounds = array<i64: 32, 2>}, {pipeline_mode = #tpu.pipeline_mode<synchronous>, transform_indices = @transform_2, window_bounds = array<i64: 1, 2>}, {transform_indices = @transform_3, window_bounds = array<i64: 16, 2>}]} {
    %c0 = arith.constant 0 : index
    %c0_0 = arith.constant 0 : index
    %0 = vector.load %arg1[%c0, %c0_0] : memref<16x32xbf16, #tpu.memory_space<vmem>>, vector<16x32xbf16>
    %c0_1 = arith.constant 0 : index
    %c0_2 = arith.constant 0 : index
    %1 = vector.load %arg2[%c0_1, %c0_2] : memref<32x2xbf16, #tpu.memory_space<vmem>>, vector<32x2xbf16>
    %cst = arith.constant dense<0.000000e+00> : vector<16x2xf32>
    %2 = tpu.matmul %0, %1, %cst {dimension_numbers = #tpu.dot_dimension_numbers<[1], [0], [0], [1], [0, 0, 1, 1], [], []>} : vector<16x32xbf16>, vector<32x2xbf16>, vector<16x2xf32> -> vector<16x2xf32>
    %c0_3 = arith.constant 0 : index
    %c0_4 = arith.constant 0 : index
    %3 = vector.load %arg3[%c0_3, %c0_4] : memref<1x2xf32, #tpu.memory_space<vmem>>, vector<1x2xf32>
    %4 = vector.broadcast %3 : vector<1x2xf32> to vector<16x2xf32>
    %5 = arith.addf %2, %4 : vector<16x2xf32>
    %6 = vector.extract_strided_slice %5 {offsets = [0, 0], sizes = [16, 1], strides = [1, 1]} : vector<16x2xf32> to vector<16x1xf32>
    %7 = vector.extract_strided_slice %5 {offsets = [0, 1], sizes = [16, 1], strides = [1, 1]} : vector<16x2xf32> to vector<16x1xf32>
    %8 = arith.maximumf %6, %7 : vector<16x1xf32>
    %9 = arith.subf %6, %8 : vector<16x1xf32>
    %10 = math.exp %9 : vector<16x1xf32>
    %11 = arith.subf %7, %8 : vector<16x1xf32>
    %12 = math.exp %11 : vector<16x1xf32>
    %13 = arith.addf %10, %12 : vector<16x1xf32>
    %14 = math.log %13 : vector<16x1xf32>
    %15 = arith.addf %8, %14 : vector<16x1xf32>
    %16 = vector.broadcast %15 : vector<16x1xf32> to vector<16x2xf32>
    %17 = arith.subf %5, %16 : vector<16x2xf32>
    %c0_5 = arith.constant 0 : index
    %c0_6 = arith.constant 0 : index
    %18 = vector.load %arg4[%c0_5, %c0_6] : memref<16x2xf32, #tpu.memory_space<vmem>>, vector<16x2xf32>
    tpu.vector_store %arg4[%c0_5, %c0_6], %17 {strides = array<i32>} : memref<16x2xf32, #tpu.memory_space<vmem>>, vector<16x2xf32>,
    return
  }
  func.func @transform_0(%arg0: i32) -> (i32, i32) {
    %c0_i32 = arith.constant 0 : i32
    %c0_i32_0 = arith.constant 0 : i32
    return %arg0, %c0_i32 : i32, i32
  }
  func.func @transform_1(%arg0: i32) -> (i32, i32) {
    %c0_i32 = arith.constant 0 : i32
    %c0_i32_0 = arith.constant 0 : i32
    %c0_i32_1 = arith.constant 0 : i32
    return %c0_i32, %c0_i32_0 : i32, i32
  }
  func.func @transform_2(%arg0: i32) -> (i32, i32) {
    %c0_i32 = arith.constant 0 : i32
    %c0_i32_0 = arith.constant 0 : i32
    %c0_i32_1 = arith.constant 0 : i32
    return %c0_i32, %c0_i32_0 : i32, i32
  }
  func.func @transform_3(%arg0: i32) -> (i32, i32) {
    %c0_i32 = arith.constant 0 : i32
    %c0_i32_0 = arith.constant 0 : i32
    return %arg0, %c0_i32 : i32, i32
  }
}

</mosaic_0001>

<bundles_post_ra>
// kernel: tpu_custom_call.1
= control target key start
LH: loop header
LB: loop body
LE: loop exit
PB: predicated region body
PF: predicated region fallthrough
CT: control target
= control target key end

     0   :  { %v193_v0 = vmov 0.0   ;;  %vm194_vm0 = vmmov 0   ;;  %vm45_vm1 = vcmask 261120   ;;  %s195_s20 = smov 127   ;;  %v197_v23 = vmov 0   ;;  %s236_s1 = inlined_call_operand.vmem [shape: bf16[32,2], index: 1, kind: input, shape index: {}]   ;;  %s237_s0 = inlined_call_operand.vmem [shape: bf16[16,32], index: 0, kind: input, shape index: {}]   ;;  %s238_s2 = inlined_call_operand.vmem [shape: f32[1,2], index: 2, kind: input, shape index: {}]   ;;  %s239_s3 = inlined_call_operand.vmem [shape: f32[16,2], index: 3, kind: output, shape index: {}]  }
   0x1   :  { %163 = vmatprep.subr.bf16.mxu0 %v193_v0  ;;  %v178_v1 = vld [vmem:[%s236_s1] sm:$0xff]   ;;  %167 = vmatprep.mubr.msk.bf16.mxu0 %vm194_vm0, %v193_v0  ;;  %v179_v2 = vld [vmem:[%s236_s1 + $0x8] sm:$0xff]   ;;  %s196_s1 = smov 1   ;;  %vm148_vm2 = vcmask 15360  }
   0x2   :  { %164 = vmatpush3.bf16.msra.mxu0 %v178_v1  ;;  %v180_v3 = vld [vmem:[%s237_s0] sm:$0xff]   ;;  %176 = vset.pattern.permute.xlu0 %v197_v23 }
   0x3   :  { %165 = vmatprep.subr.bf16.mxu0 %v193_v0  ;;  %v155_v4 = vld [vmem:[%s238_s2] ss:$0 sm:$0xff]  ;;  %177 = vset.pattern.permute.xlu1 %v197_v23 }
   0x6   :  { %166 = vmatpush3.bf16.msra.mxu0 %v179_v2 }
   0x9   :  { %168 = vmatmul.mubr.msk.bf16.vlgmr.msra.gmra.mrb[0].mxu0 %vm45_vm1, %v180_v3 }
  0xdc   :  { %v83_v5 = vpop.f32.mrb[0].mxu0 }
  0xdd   :  { %v84_v6 = vadd.f32 %v155_v4, %v83_v5  ;;  %v169_v7 = vpop.f32.mrb[1].mxu0 }
  0xde   :  { %v86_v8 = vpop.f32.mrb[2].mxu0 }
  0xdf   :  { %92 = vrot.lane.b32.xlu0 %v84_v6, %s195_s20  ;;  %v170_v9 = vpop.f32.mrb[3].mxu0  ;;  %v87_v10 = vadd.f32 %v155_v4, %v86_v8 }
  0xe3   :  { %94 = vrot.lane.b32.xlu0 %v87_v10, %s195_s20 }
 0x151   :  { %v93_v11 = vpop.permute.xlu0 %92 }
 0x152   :  { %v98_v12 = vmax.f32 %v84_v6, %v93_v11 }
 0x154   :  { %108 = vrot.lane.b32.xlu1 %v98_v12, %s196_s1  ;;  %v100_v24 = vsub.f32 %v84_v6, %v98_v12 }
 0x155   :  { %v95_v13 = vpop.permute.xlu0 %94 }
 0x156   :  { %v99_v14 = vmax.f32 %v87_v10, %v95_v13  ;;  %v102_v25 = vmul.f32 1.442695, %v100_v24 }
 0x158   :  { %110 = vrot.lane.b32.xlu1 %v99_v14, %s196_s1  ;;  %v101_v26 = vsub.f32 %v87_v10, %v99_v14 }
 0x15a   :  { %v104_v27 = vmul.f32 1.442695, %v101_v26 }
 0x1c6   :  { %v109_v15 = vpop.permute.xlu1 %108 }
 0x1c7   :  { %v114_v16 = vsub.f32 %v84_v6, %v109_v15 }
 0x1c9   :  { %v116_v17 = vmul.f32 1.442695, %v114_v16 }
 0x1ca   :  { %v111_v18 = vpop.permute.xlu1 %110 }
 0x1cb   :  { %181 = vpow2.f32 %v116_v17  ;;  %v115_v19 = vsub.f32 %v87_v10, %v111_v18 }
 0x1cd   :  { %v118_v20 = vmul.f32 1.442695, %v115_v19 }
 0x1cf   :  { %183 = vpow2.f32 %v118_v20 }
 0x1d0   :  { %185 = vpow2.f32 %v102_v25 }
 0x1d1   :  { %187 = vpow2.f32 %v104_v27 }
 0x1d5   :  { %v182_v21 = vpop.eup %181 }
 0x1d6   :  { %122 = vrot.lane.b32.xlu0 %v182_v21, %s195_s20 }
 0x1d9   :  { %v184_v22 = vpop.eup %183 }
 0x1da   :  { %124 = vrot.lane.b32.xlu1 %v184_v22, %s195_s20  ;;  %v186_v28 = vpop.eup %185 }
 0x1db   :  { %v188_v31 = vpop.eup %187 }
 0x248   :  { %v123_v29 = vpop.permute.xlu0 %122 }
 0x249   :  { %v128_v30 = vadd.f32 %v186_v28, %v123_v29 }
 0x24b   :  { %189 = vlog2.f32 %v128_v30 }
 0x24c   :  { %v125_v32 = vpop.permute.xlu1 %124 }
 0x24d   :  { %v129_v33 = vadd.f32 %v188_v31, %v125_v32 }
 0x24f   :  { %191 = vlog2.f32 %v129_v33 }
 0x255   :  { %v190_v34 = vpop.eup %189 }
 0x256   :  { %v131_v35 = vmul.f32 0.6931472, %v190_v34 }
 0x258   :  { %v134_v36 = vadd.f32 %v131_v35, %v98_v12 }
 0x259   :  { %v192_v37 = vpop.eup %191 }
 0x25a   :  { %v133_v38 = vmul.f32 0.6931472, %v192_v37  ;;  %138 = vperm.xlu0 %176, %v134_v36  }
 0x25c   :  { %v135_v39 = vadd.f32 %v133_v38, %v99_v14 }
 0x25e   :  { %143 = vperm.xlu1 %177, %v135_v39  }
 0x2d9   :  { %v139_v40 = vpop.permute.xlu0 %138 }
 0x2da   :  { %v146_v41 = vsub.f32 %v84_v6, %v139_v40 }
 0x2dc   :  { %149 = vst.msk [vmem:[%s239_s3] sm:$0xff] %vm148_vm2, %v146_v41 }
 0x2dd   :  { %v144_v42 = vpop.permute.xlu1 %143 }
 0x2de   :  { %v147_v43 = vsub.f32 %v87_v10, %v144_v42 }
 0x2e0   :  { %150 = vst.msk [vmem:[%s239_s3 + $0x8] sm:$0xff] %vm148_vm2, %v147_v43 }

</bundles_post_ra>
